<compile_context>
chip_gen: v5e
topology: v5e:2x2
jax: 0.10.0
libtpu: 0.0.40
codegen_flags: <defaults>
</compile_context>

<pallas_src>
import jax
import jax.numpy as jnp
from jax.experimental import pallas as pl
from jax.experimental.pallas import tpu as pltpu

NEG_SLOPE = 0.01  # F.leaky_relu default negative_slope


def _round_up(x, m):
    return ((x + m - 1) // m) * m


def _align8_down(x):
    return max(8, (x // 8) * 8)


def _vmem_budget_bytes():
    """~70% of physical VMEM per TensorCore; conservative fallback if query fails."""
    try:
        cap = pltpu.get_tpu_info().vmem_capacity_bytes
    except Exception:
        cap = 64 * (1 << 20)  # v7x per-TC physical; safe lower bound for all gens
    return int(cap * 0.7)


def _aligned_divisors(dim):
    """128-multiple divisors of dim (ascending)."""
    return [t for t in range(128, dim + 1, 128) if dim % t == 0]


# ----------------------------------------------------------------------------
# Path A: whole weight resident in VMEM, 1-D grid over row tiles.
# ----------------------------------------------------------------------------
def _rdblock_kernel_resident(x_ref, w_ref, b_ref, o_ref):
    """o = x + leaky_relu(x @ W + b); W pre-transposed to (in, out)."""
    x = x_ref[...]
    y = jnp.dot(x, w_ref[...], preferred_element_type=jnp.float32)
    y = y + b_ref[...].astype(jnp.float32)
    y = jnp.maximum(y, NEG_SLOPE * y)            # leaky relu (0 < slope < 1)
    o_ref[...] = (x.astype(jnp.float32) + y).astype(o_ref.dtype)


# ----------------------------------------------------------------------------
# Path B: 3-axis blocked matmul (M, N, K) with f32 VMEM accumulator.
# ----------------------------------------------------------------------------
def _rdblock_kernel_ktiled(x_ref, w_ref, xres_ref, b_ref, o_ref, acc_ref):
    k = pl.program_id(2)

    @pl.when(k == 0)
    def _():
        acc_ref[...] = jnp.zeros_like(acc_ref)

    acc_ref[...] += jnp.dot(x_ref[...], w_ref[...],
                            preferred_element_type=jnp.float32)

    @pl.when(k == pl.num_programs(2) - 1)
    def _():
        y = acc_ref[...] + b_ref[...].astype(jnp.float32)
        y = jnp.maximum(y, NEG_SLOPE * y)
        o_ref[...] = (xres_ref[...].astype(jnp.float32) + y).astype(o_ref.dtype)


def rdblock_forward(x, weight, bias, *, tile_b=512, tile_n=512, tile_k=512,
                    force_k_tiling=False):
    """x: (B, dim). weight: (dim, dim) PyTorch (out, in). bias: (dim,).
    Returns x + leaky_relu(x @ weight.T + bias)."""
    B, dim = x.shape
    assert weight.shape == (dim, dim) and bias.shape == (dim,)

    itemsize = jnp.dtype(x.dtype).itemsize
    vmem_budget = _vmem_budget_bytes()
    vmem_limit = int(vmem_budget)

    # Single wrapper-side transpose: (out, in) -> (in, out). Kernel then uses the
    # standard K-last / K-first contraction, so Mosaic never emits a per-step
    # weight transpose.
    wt = weight.T
    b2 = bias.reshape(1, dim)

    # ---------------- Path A sizing ----------------
    def path_a_vmem(tb):
        # x + out tiles double-buffered; weight + bias conservatively counted x2.
        return (4 * tb * dim + 2 * (dim * dim + dim)) * itemsize

    use_resident = not force_k_tiling
    if use_resident:
        tb_a = _align8_down(min(tile_b, _round_up(B, 8)))
        while path_a_vmem(tb_a) > vmem_budget and tb_a > 8:
            tb_a = _align8_down(tb_a // 2)
        if path_a_vmem(tb_a) > vmem_budget:
            use_resident = False  # weight too big for VMEM -> K-tiled path

    if use_resident:
        m_steps = pl.cdiv(B, tb_a)
        return pl.pallas_call(
            _rdblock_kernel_resident,
            out_shape=jax.ShapeDtypeStruct((B, dim), x.dtype),
            grid_spec=pltpu.PrefetchScalarGridSpec(
                num_scalar_prefetch=0,
                grid=(m_steps,),
                in_specs=[
                    pl.BlockSpec((tb_a, dim), lambda i: (i, 0)),   # x row tile
                    pl.BlockSpec((dim, dim), lambda i: (0, 0)),    # W (in,out), resident
                    pl.BlockSpec((1, dim), lambda i: (0, 0)),      # bias, resident
                ],
                out_specs=pl.BlockSpec((tb_a, dim), lambda i: (i, 0)),
            ),
            compiler_params=pltpu.CompilerParams(
                dimension_semantics=("parallel",),
                vmem_limit_bytes=vmem_limit),
        )(x, wt, b2)

    # ---------------- Path B sizing ----------------
    divs = _aligned_divisors(dim)
    if divs:
        tn = max([t for t in divs if t <= max(tile_n, 128)] or [divs[0]])
        tk = max([t for t in divs if t <= max(tile_k, 128)] or [divs[0]])
        tn_min, tk_min = divs[0], divs[0]
    else:
        # TODO(synk): pad dim to a 128 multiple instead of full-dim fallback blocks.
        tn = tk = tn_min = tk_min = dim

    def path_b_vmem(tb, tn_, tk_):
        return (2 * (tb * tk_ + tk_ * tn_ + 2 * tb * tn_ + tn_) * itemsize
                + tb * tn_ * 4)  # f32 accumulator (single copy)

    tb = _align8_down(min(tile_b, _round_up(B, 8)))
    while path_b_vmem(tb, tn, tk) > vmem_budget and tb > 8:
        tb = _align8_down(tb // 2)
    if path_b_vmem(tb, tn, tk) > vmem_budget:
        tn = tn_min
    if path_b_vmem(tb, tn, tk) > vmem_budget:
        tk = tk_min
    assert path_b_vmem(tb, tn, tk) <= vmem_budget, "tile choice exceeds VMEM budget"

    m_steps = pl.cdiv(B, tb)
    n_steps = dim // tn
    k_steps = dim // tk

    return pl.pallas_call(
        _rdblock_kernel_ktiled,
        out_shape=jax.ShapeDtypeStruct((B, dim), x.dtype),
        grid_spec=pltpu.PrefetchScalarGridSpec(
            num_scalar_prefetch=0,
            grid=(m_steps, n_steps, k_steps),
            in_specs=[
                pl.BlockSpec((tb, tk), lambda i, j, k: (i, k)),    # x (matmul LHS)
                pl.BlockSpec((tk, tn), lambda i, j, k: (k, j)),    # W (in,out) block
                pl.BlockSpec((tb, tn), lambda i, j, k: (i, j)),    # x residual cols
                pl.BlockSpec((1, tn), lambda i, j, k: (0, j)),     # bias tile
            ],
            out_specs=pl.BlockSpec((tb, tn), lambda i, j, k: (i, j)),
            scratch_shapes=[pltpu.VMEM((tb, tn), jnp.float32)],
        ),
        compiler_params=pltpu.CompilerParams(
            dimension_semantics=("parallel", "parallel", "arbitrary"),
            vmem_limit_bytes=vmem_limit),
    )(x, wt, x, b2)


def rdblock_reference(x, weight, bias):
    y = x @ weight.T + bias
    y = jnp.where(y >= 0, y, NEG_SLOPE * y)
    return x + y


if __name__ == "__main__":
    key = jax.random.PRNGKey(0)
    # Small but tiling-exercising shapes (128-multiples keep stores lane-dense).
    B, dim = 256, 256

    kx, kw, kb = jax.random.split(key, 3)
    x = jax.random.normal(kx, (B, dim), dtype=jnp.float32)
    # Deterministic synthetic parameter init (nn.Linear-like uniform bound).
    bound = float(dim) ** -0.5
    weight = jax.random.uniform(kw, (dim, dim), minval=-bound, maxval=bound,
                                dtype=jnp.float32)
    bias = jax.random.uniform(kb, (dim,), minval=-bound, maxval=bound,
                              dtype=jnp.float32)

    ref = rdblock_reference(x, weight, bias)

    # Path A: weight resident in VMEM, 1-D row grid (the common case).
    out_a = jax.block_until_ready(rdblock_forward(x, weight, bias))
    assert out_a.shape == (B, dim)
    err_a = float(jnp.max(jnp.abs(out_a - ref)))
    assert jnp.allclose(out_a, ref, atol=1e-4, rtol=1e-4), (
        f"resident path mismatch (max abs err {err_a})")

    # Path B: K-tiled accumulator path (used automatically when the weight does
    # not fit VMEM); forced here at small tiles to exercise the 3-axis grid.
    out_b = jax.block_until_ready(
        rdblock_forward(x, weight, bias, tile_b=128, tile_n=128, tile_k=128,
                        force_k_tiling=True))
    err_b = float(jnp.max(jnp.abs(out_b - ref)))
    assert jnp.allclose(out_b, ref, atol=1e-4, rtol=1e-4), (
        f"k-tiled path mismatch (max abs err {err_b})")

    print("KERNEL_OK")
</pallas_src>

<mosaic_0001>
module attributes {stable_mosaic.version = 11 : i64} {
  func.func @_rdblock_kernel_resident(%arg0: i32, %arg1: memref<256x256xf32, #tpu.memory_space<vmem>>, %arg2: memref<256x256xf32, #tpu.memory_space<vmem>>, %arg3: memref<1x256xf32, #tpu.memory_space<vmem>>, %arg4: memref<256x256xf32, #tpu.memory_space<vmem>>) attributes {dimension_semantics = [#tpu.dimension_semantics<parallel>], iteration_bounds = array<i64: 1>, scalar_prefetch = 0 : i64, scratch_operands = 0 : i64, tpu.core_type = #tpu.core_type<tc>, window_params = [{transform_indices = @transform_0, window_bounds = array<i64: 256, 256>}, {pipeline_mode = #tpu.pipeline_mode<synchronous>, transform_indices = @transform_1, window_bounds = array<i64: 256, 256>}, {pipeline_mode = #tpu.pipeline_mode<synchronous>, transform_indices = @transform_2, window_bounds = array<i64: 1, 256>}, {transform_indices = @transform_3, window_bounds = array<i64: 256, 256>}]} {
    %c0 = arith.constant 0 : index
    %c0_0 = arith.constant 0 : index
    %0 = vector.load %arg1[%c0, %c0_0] : memref<256x256xf32, #tpu.memory_space<vmem>>, vector<256x256xf32>
    %c0_1 = arith.constant 0 : index
    %c0_2 = arith.constant 0 : index
    %1 = vector.load %arg2[%c0_1, %c0_2] : memref<256x256xf32, #tpu.memory_space<vmem>>, vector<256x256xf32>
    %cst = arith.constant dense<0.000000e+00> : vector<256x256xf32>
    %2 = tpu.matmul %0, %1, %cst {dimension_numbers = #tpu.dot_dimension_numbers<[1], [0], [0], [1], [0, 0, 1, 1], [], []>} : vector<256x256xf32>, vector<256x256xf32>, vector<256x256xf32> -> vector<256x256xf32>
    %c0_3 = arith.constant 0 : index
    %c0_4 = arith.constant 0 : index
    %3 = vector.load %arg3[%c0_3, %c0_4] : memref<1x256xf32, #tpu.memory_space<vmem>>, vector<1x256xf32>
    %4 = vector.broadcast %3 : vector<1x256xf32> to vector<256x256xf32>
    %5 = arith.addf %2, %4 : vector<256x256xf32>
    %cst_5 = arith.constant 0.00999999977 : f32
    %6 = vector.broadcast %cst_5 : f32 to vector<256x256xf32>
    %7 = arith.mulf %6, %5 : vector<256x256xf32>
    %8 = arith.maximumf %5, %7 : vector<256x256xf32>
    %9 = arith.addf %0, %8 : vector<256x256xf32>
    %c0_6 = arith.constant 0 : index
    %c0_7 = arith.constant 0 : index
    %10 = vector.load %arg4[%c0_6, %c0_7] : memref<256x256xf32, #tpu.memory_space<vmem>>, vector<256x256xf32>
    tpu.vector_store %arg4[%c0_6, %c0_7], %9 {strides = array<i32>} : memref<256x256xf32, #tpu.memory_space<vmem>>, vector<256x256xf32>,
    return
  }
  func.func @transform_0(%arg0: i32) -> (i32, i32) {
    %c0_i32 = arith.constant 0 : i32
    %c0_i32_0 = arith.constant 0 : i32
    return %arg0, %c0_i32 : i32, i32
  }
  func.func @transform_1(%arg0: i32) -> (i32, i32) {
    %c0_i32 = arith.constant 0 : i32
    %c0_i32_0 = arith.constant 0 : i32
    %c0_i32_1 = arith.constant 0 : i32
    return %c0_i32, %c0_i32_0 : i32, i32
  }
  func.func @transform_2(%arg0: i32) -> (i32, i32) {
    %c0_i32 = arith.constant 0 : i32
    %c0_i32_0 = arith.constant 0 : i32
    %c0_i32_1 = arith.constant 0 : i32
    return %c0_i32, %c0_i32_0 : i32, i32
  }
  func.func @transform_3(%arg0: i32) -> (i32, i32) {
    %c0_i32 = arith.constant 0 : i32
    %c0_i32_0 = arith.constant 0 : i32
    return %arg0, %c0_i32 : i32, i32
  }
}

</mosaic_0001>

<bundles_post_ra>
// kernel: tpu_custom_call.1
= control target key start
LH: loop header
LB: loop body
LE: loop exit
PB: predicated region body
PF: predicated region fallthrough
CT: control target
= control target key end

     0   :  { %8 = vsyncpa [#allocation3], 0  ;;  %s1465_s0 = inlined_call_operand.hbm [shape: f32[256,256], index: 0, kind: input, shape index: {}]   ;;  %s1466_s1 = inlined_call_operand.hbm [shape: f32[256,256], index: 1, kind: input, shape index: {}]   ;;  %s1467_s2 = inlined_call_operand.hbm [shape: f32[1,256], index: 2, kind: input, shape index: {}]   ;;  %s1468_s3 = inlined_call_operand.hbm [shape: f32[256,256], index: 3, kind: output, shape index: {}]  }
   0x1   :  { %9 = vsyncpa [#allocation6], 0 }
   0x2   :  { %10 = vsyncpa [#allocation4], 0  ;;  %s28_s14 = sshll.u32 %s1466_s1, 4  ;;  %s1030_s15 = smov [#allocation5]   ;;  %s29_s14 = int_to_ptr.hbm [resolvable:$true] %s28_s14 }
   0x3   :  { %s30_s16 = sshll.u32 %s1030_s15, 4  ;;  %s15_s19 = sshll.u32 %s1465_s0, 4  ;;  %s31_s16 = int_to_ptr.vmem [resolvable:$true] %s30_s16  ;;  %s16_s19 = int_to_ptr.hbm [resolvable:$true] %s15_s19 }
   0x4   :  { %s1031_s20 = smov 256   ;;  %s1032_s21 = smov 16  }
   0x5   :  { %36 = dma.hbm_to_vmem [thread:$0]  %s29_s14, 8192, %s31_s16, [#allocation6], %s1031_s20, %s1031_s20, %s1032_s21  }
   0x6   :  { %s1033_s22 = smov [#allocation2]   ;;  %s42_s1 = sshll.u32 %s1467_s2, 4  ;;  %s43_s1 = int_to_ptr.hbm [resolvable:$true] %s42_s1 }
   0x7   :  { %s17_s23 = sshll.u32 %s1033_s22, 4  ;;  %s1034_s0 = smov [#allocation7]   ;;  %s18_s23 = int_to_ptr.vmem [resolvable:$true] %s17_s23 }
   0x8   :  { %23 = dma.hbm_to_vmem [thread:$0]  %s16_s19, 8192, %s18_s23, [#allocation3], %s1031_s20, %s1031_s20, %s1032_s21  }
   0x9   :  { %s44_s26 = sshll.u32 %s1034_s0, 4  ;;  %s45_s26 = int_to_ptr.vmem [resolvable:$true] %s44_s26 }
   0xa   :  { %47 = dma.hbm_to_vmem [thread:$0]  %s43_s1, 32, %s45_s26, [#allocation6]  }
   0xb   :  { %1024 = dma.done.wait [#allocation3], 8192  }
   0xc   :  { %1025 = vsyncadd [#allocation3], 4294959104 }
   0xd   :  { %1026 = dma.done.wait [#allocation6], 8224  }
   0xe   :  { %1027 = vsyncadd [#allocation6], 4294959072  ;;  %v155_v0 = vld [vmem:[#allocation5 + $0xf8] sm:$0xff]  ;;  %v153_v1 = vld [vmem:[#allocation5 + $0xe8] sm:$0xff]  ;;  %s1035_s2 = smov [#allocation8]   ;;  %s908_s30 = sshll.u32 %s1468_s3, 4  ;;  %s909_s30 = int_to_ptr.hbm [resolvable:$true] %s908_s30 }
   0xf   :  { %v187_v2 = vld [vmem:[#allocation5 + $0x1f8] sm:$0xff]  ;;  %420 = vmatpush.msra.mxu2 %v155_v0  ;;  %v154_v3 = vld [vmem:[#allocation5 + $0xf0] sm:$0xff]  ;;  %v185_v4 = vld [vmem:[#allocation5 + $0x1e8] sm:$0xff]  ;;  %s906_s27 = sshll.u32 %s1035_s2, 4  ;;  %s907_s27 = int_to_ptr.vmem [resolvable:$true] %s906_s27 }
  0x10   :  { %533 = vmatpush.msra.mxu3 %v187_v2  ;;  %194 = vmatpush.msra.mxu0 %v154_v3  ;;  %v151_v5 = vld [vmem:[#allocation5 + $0xd8] sm:$0xff]  ;;  %v152_v6 = vld [vmem:[#allocation5 + $0xe0] sm:$0xff]  ;;  %v186_v7 = vld [vmem:[#allocation5 + $0x1f0] sm:$0xff] }
  0x11   :  { %421 = vmatpush.msra.mxu2 %v153_v1  ;;  %v183_v8 = vld [vmem:[#allocation5 + $0x1d8] sm:$0xff]  ;;  %v150_v9 = vld [vmem:[#allocation5 + $0xd0] sm:$0xff]  ;;  %v184_v10 = vld [vmem:[#allocation5 + $0x1e0] sm:$0xff]  ;;  %307 = vmatpush.msra.mxu1 %v186_v7 }
  0x12   :  { %534 = vmatpush.msra.mxu3 %v185_v4  ;;  %195 = vmatpush.msra.mxu0 %v152_v6  ;;  %v149_v11 = vld [vmem:[#allocation5 + $0xc8] sm:$0xff]  ;;  %v148_v13 = vld [vmem:[#allocation5 + $0xc0] sm:$0xff]  ;;  %v182_v14 = vld [vmem:[#allocation5 + $0x1d0] sm:$0xff] }
  0x13   :  { %v181_v12 = vld [vmem:[#allocation5 + $0x1c8] sm:$0xff]  ;;  %422 = vmatpush.msra.mxu2 %v151_v5  ;;  %308 = vmatpush.msra.mxu1 %v184_v10  ;;  %v147_v15 = vld [vmem:[#allocation5 + $0xb8] sm:$0xff]  ;;  %v146_v17 = vld [vmem:[#allocation5 + $0xb0] sm:$0xff] }
  0x14   :  { %535 = vmatpush.msra.mxu3 %v183_v8  ;;  %196 = vmatpush.msra.mxu0 %v150_v9  ;;  %v179_v16 = vld [vmem:[#allocation5 + $0x1b8] sm:$0xff]  ;;  %v180_v18 = vld [vmem:[#allocation5 + $0x1c0] sm:$0xff]  ;;  %v145_v19 = vld [vmem:[#allocation5 + $0xa8] sm:$0xff] }
  0x15   :  { %423 = vmatpush.msra.mxu2 %v149_v11  ;;  %309 = vmatpush.msra.mxu1 %v182_v14  ;;  %v177_v20 = vld [vmem:[#allocation5 + $0x1a8] sm:$0xff]  ;;  %v144_v21 = vld [vmem:[#allocation5 + $0xa0] sm:$0xff]  ;;  %v178_v22 = vld [vmem:[#allocation5 + $0x1b0] sm:$0xff] }
  0x16   :  { %536 = vmatpush.msra.mxu3 %v181_v12  ;;  %197 = vmatpush.msra.mxu0 %v148_v13  ;;  %v143_v23 = vld [vmem:[#allocation5 + $0x98] sm:$0xff]  ;;  %v142_v25 = vld [vmem:[#allocation5 + $0x90] sm:$0xff]  ;;  %v176_v26 = vld [vmem:[#allocation5 + $0x1a0] sm:$0xff] }
  0x17   :  { %424 = vmatpush.msra.mxu2 %v147_v15  ;;  %310 = vmatpush.msra.mxu1 %v180_v18  ;;  %v175_v24 = vld [vmem:[#allocation5 + $0x198] sm:$0xff]  ;;  %v141_v27 = vld [vmem:[#allocation5 + $0x88] sm:$0xff]  ;;  %v140_v29 = vld [vmem:[#allocation5 + $0x80] sm:$0xff] }
  0x18   :  { %537 = vmatpush.msra.mxu3 %v179_v16  ;;  %198 = vmatpush.msra.mxu0 %v146_v17  ;;  %v173_v28 = vld [vmem:[#allocation5 + $0x188] sm:$0xff]  ;;  %v174_v30 = vld [vmem:[#allocation5 + $0x190] sm:$0xff]  ;;  %v139_v31 = vld [vmem:[#allocation5 + $0x78] sm:$0xff] }
  0x19   :  { %425 = vmatpush.msra.mxu2 %v145_v19  ;;  %311 = vmatpush.msra.mxu1 %v178_v22  ;;  %v171_v32 = vld [vmem:[#allocation5 + $0x178] sm:$0xff]  ;;  %v138_v33 = vld [vmem:[#allocation5 + $0x70] sm:$0xff]  ;;  %v172_v34 = vld [vmem:[#allocation5 + $0x180] sm:$0xff] }
  0x1a   :  { %538 = vmatpush.msra.mxu3 %v177_v20  ;;  %199 = vmatpush.msra.mxu0 %v144_v21  ;;  %v137_v35 = vld [vmem:[#allocation5 + $0x68] sm:$0xff]  ;;  %v136_v37 = vld [vmem:[#allocation5 + $0x60] sm:$0xff]  ;;  %v170_v38 = vld [vmem:[#allocation5 + $0x170] sm:$0xff] }
  0x1b   :  { %426 = vmatpush.msra.mxu2 %v143_v23  ;;  %312 = vmatpush.msra.mxu1 %v176_v26  ;;  %v169_v36 = vld [vmem:[#allocation5 + $0x168] sm:$0xff]  ;;  %v135_v39 = vld [vmem:[#allocation5 + $0x58] sm:$0xff]  ;;  %v134_v41 = vld [vmem:[#allocation5 + $0x50] sm:$0xff] }
  0x1c   :  { %539 = vmatpush.msra.mxu3 %v175_v24  ;;  %200 = vmatpush.msra.mxu0 %v142_v25  ;;  %v167_v40 = vld [vmem:[#allocation5 + $0x158] sm:$0xff]  ;;  %v168_v42 = vld [vmem:[#allocation5 + $0x160] sm:$0xff]  ;;  %v133_v43 = vld [vmem:[#allocation5 + $0x48] sm:$0xff] }
  0x1d   :  { %427 = vmatpush.msra.mxu2 %v141_v27  ;;  %313 = vmatpush.msra.mxu1 %v174_v30  ;;  %v165_v44 = vld [vmem:[#allocation5 + $0x148] sm:$0xff]  ;;  %v132_v45 = vld [vmem:[#allocation5 + $0x40] sm:$0xff]  ;;  %v166_v46 = vld [vmem:[#allocation5 + $0x150] sm:$0xff] }
  0x1e   :  { %540 = vmatpush.msra.mxu3 %v173_v28  ;;  %201 = vmatpush.msra.mxu0 %v140_v29  ;;  %v131_v47 = vld [vmem:[#allocation5 + $0x38] sm:$0xff]  ;;  %v130_v49 = vld [vmem:[#allocation5 + $0x30] sm:$0xff]  ;;  %v164_v50 = vld [vmem:[#allocation5 + $0x140] sm:$0xff] }
  0x1f   :  { %428 = vmatpush.msra.mxu2 %v139_v31  ;;  %314 = vmatpush.msra.mxu1 %v172_v34  ;;  %v163_v48 = vld [vmem:[#allocation5 + $0x138] sm:$0xff]  ;;  %v129_v51 = vld [vmem:[#allocation5 + $0x28] sm:$0xff]  ;;  %v128_v53 = vld [vmem:[#allocation5 + $0x20] sm:$0xff] }
  0x20   :  { %541 = vmatpush.msra.mxu3 %v171_v32  ;;  %202 = vmatpush.msra.mxu0 %v138_v33  ;;  %v161_v52 = vld [vmem:[#allocation5 + $0x128] sm:$0xff]  ;;  %v162_v54 = vld [vmem:[#allocation5 + $0x130] sm:$0xff]  ;;  %v127_v55 = vld [vmem:[#allocation5 + $0x18] sm:$0xff] }
  0x21   :  { %429 = vmatpush.msra.mxu2 %v137_v35  ;;  %315 = vmatpush.msra.mxu1 %v170_v38  ;;  %v159_v56 = vld [vmem:[#allocation5 + $0x118] sm:$0xff]  ;;  %v126_v57 = vld [vmem:[#allocation5 + $0x10] sm:$0xff]  ;;  %v160_v58 = vld [vmem:[#allocation5 + $0x120] sm:$0xff] }
  0x22   :  { %542 = vmatpush.msra.mxu3 %v169_v36  ;;  %203 = vmatpush.msra.mxu0 %v136_v37  ;;  %v125_v59 = vld [vmem:[#allocation5 + $0x8] sm:$0xff]  ;;  %v1071_v61 = vld [vmem:[#allocation2] sm:$0xff]  ;;  %v158_v0 = vld [vmem:[#allocation5 + $0x110] sm:$0xff] }
  0x23   :  { %430 = vmatpush.msra.mxu2 %v135_v39  ;;  %316 = vmatpush.msra.mxu1 %v168_v42  ;;  %v157_v60 = vld [vmem:[#allocation5 + $0x108] sm:$0xff]  ;;  %v124_v63 = vld [vmem:[#allocation5] sm:$0xff]  ;;  %v1079_v2 = vld [vmem:[#allocation2 + $0x10] sm:$0xff] }
  0x24   :  { %543 = vmatpush.msra.mxu3 %v167_v40  ;;  %204 = vmatpush.msra.mxu0 %v134_v41  ;;  %v1073_v62 = vld [vmem:[#allocation2 + $0x8] sm:$0xff]  ;;  %v156_v1 = vld [vmem:[#allocation5 + $0x100] sm:$0xff]  ;;  %v1081_v3 = vld [vmem:[#allocation2 + $0x18] sm:$0xff] }
  0x25   :  { %431 = vmatpush.msra.mxu2 %v133_v43  ;;  %317 = vmatpush.msra.mxu1 %v166_v46  ;;  %v1087_v4 = vld [vmem:[#allocation2 + $0x20] sm:$0xff]  ;;  %v1089_v5 = vld [vmem:[#allocation2 + $0x28] sm:$0xff]  ;;  %v1095_v6 = vld [vmem:[#allocation2 + $0x30] sm:$0xff] }
  0x26   :  { %544 = vmatpush.msra.mxu3 %v165_v44  ;;  %205 = vmatpush.msra.mxu0 %v132_v45  ;;  %v1097_v7 = vld [vmem:[#allocation2 + $0x38] sm:$0xff]  ;;  %v1103_v8 = vld [vmem:[#allocation2 + $0x40] sm:$0xff]  ;;  %v1105_v9 = vld [vmem:[#allocation2 + $0x48] sm:$0xff] }
  0x27   :  { %432 = vmatpush.msra.mxu2 %v131_v47  ;;  %318 = vmatpush.msra.mxu1 %v164_v50  ;;  %v1111_v10 = vld [vmem:[#allocation2 + $0x50] sm:$0xff]  ;;  %v1113_v11 = vld [vmem:[#allocation2 + $0x58] sm:$0xff]  ;;  %v1119_v12 = vld [vmem:[#allocation2 + $0x60] sm:$0xff] }
  0x28   :  { %545 = vmatpush.msra.mxu3 %v163_v48  ;;  %206 = vmatpush.msra.mxu0 %v130_v49  ;;  %v1121_v13 = vld [vmem:[#allocation2 + $0x68] sm:$0xff]  ;;  %v1127_v14 = vld [vmem:[#allocation2 + $0x70] sm:$0xff]  ;;  %v1129_v15 = vld [vmem:[#allocation2 + $0x78] sm:$0xff] }
  0x29   :  { %433 = vmatpush.msra.mxu2 %v129_v51  ;;  %319 = vmatpush.msra.mxu1 %v162_v54  ;;  %v1135_v16 = vld [vmem:[#allocation2 + $0x80] sm:$0xff]  ;;  %v1137_v17 = vld [vmem:[#allocation2 + $0x88] sm:$0xff]  ;;  %v1143_v18 = vld [vmem:[#allocation2 + $0x90] sm:$0xff] }
  0x2a   :  { %546 = vmatpush.msra.mxu3 %v161_v52  ;;  %207 = vmatpush.msra.mxu0 %v128_v53  ;;  %v1145_v19 = vld [vmem:[#allocation2 + $0x98] sm:$0xff]  ;;  %v1151_v20 = vld [vmem:[#allocation2 + $0xa0] sm:$0xff]  ;;  %v1153_v21 = vld [vmem:[#allocation2 + $0xa8] sm:$0xff] }
  0x2b   :  { %434 = vmatpush.msra.mxu2 %v127_v55  ;;  %320 = vmatpush.msra.mxu1 %v160_v58  ;;  %v1159_v22 = vld [vmem:[#allocation2 + $0xb0] sm:$0xff]  ;;  %v1161_v23 = vld [vmem:[#allocation2 + $0xb8] sm:$0xff]  ;;  %v1167_v24 = vld [vmem:[#allocation2 + $0xc0] sm:$0xff] }
  0x2c   :  { %547 = vmatpush.msra.mxu3 %v159_v56  ;;  %208 = vmatpush.msra.mxu0 %v126_v57  ;;  %v1169_v25 = vld [vmem:[#allocation2 + $0xc8] sm:$0xff]  ;;  %v1175_v26 = vld [vmem:[#allocation2 + $0xd0] sm:$0xff]  ;;  %v1177_v27 = vld [vmem:[#allocation2 + $0xd8] sm:$0xff] }
  0x2d   :  { %435 = vmatpush.msra.mxu2 %v125_v59  ;;  %321 = vmatpush.msra.mxu1 %v158_v0  ;;  %v1183_v28 = vld [vmem:[#allocation2 + $0xe0] sm:$0xff]  ;;  %v1185_v29 = vld [vmem:[#allocation2 + $0xe8] sm:$0xff]  ;;  %v1191_v30 = vld [vmem:[#allocation2 + $0xf0] sm:$0xff] }
  0x2e   :  { %548 = vmatpush.msra.mxu3 %v157_v60  ;;  %436 = vmatmul.f32.vlgmr.msra.gmra.mxu2 %v1071_v61  ;;  %v1193_v31 = vld [vmem:[#allocation2 + $0xf8] sm:$0xff]  ;;  %v188_v32 = vld [vmem:[#allocation7] sm:$0x3]  ;;  %v1203_v35 = vld [vmem:[#allocation2 + $0x108] sm:$0xff] }
  0x2f   :  { %549 = vmatmul.f32.vlgmr.msra.gmra.mxu3 %v1073_v62  ;;  %209 = vmatpush.msra.mxu0 %v124_v63  ;;  %v1199_v33 = vperm.slane %v188_v32, 0  ;;  %v1201_v34 = vld [vmem:[#allocation2 + $0x100] sm:$0xff]  ;;  %v1208_v38 = vperm.slane %v188_v32, 1  ;;  %v1213_v45 = vld [vmem:[#allocation2 + $0x110] sm:$0xff]  ;;  %v1215_v46 = vld [vmem:[#allocation2 + $0x118] sm:$0xff] }
  0x30   :  { %210 = vmatmul.f32.vlgmr.msra.gmra.mxu0 %v1071_v61  ;;  %322 = vmatpush.msra.mxu1 %v156_v1  ;;  %v1227_v63 = vld [vmem:[#allocation2 + $0x128] sm:$0xff] }
  0x31   :  { %323 = vmatmul.f32.vlgmr.msra.gmra.mxu1 %v1073_v62 }
  0x36   :  { %439 = vmatmul.f32.gmra.mxu2 %v1079_v2 }
  0x37   :  { %552 = vmatmul.f32.gmra.mxu3 %v1081_v3 }
  0x38   :  { %213 = vmatmul.f32.gmra.mxu0 %v1079_v2 }
  0x39   :  { %326 = vmatmul.f32.gmra.mxu1 %v1081_v3 }
  0x3e   :  { %442 = vmatmul.f32.gmra.mxu2 %v1087_v4 }
  0x3f   :  { %555 = vmatmul.f32.gmra.mxu3 %v1089_v5 }
  0x40   :  { %216 = vmatmul.f32.gmra.mxu0 %v1087_v4 }
  0x41   :  { %329 = vmatmul.f32.gmra.mxu1 %v1089_v5 }
  0x46   :  { %445 = vmatmul.f32.gmra.mxu2 %v1095_v6 }
  0x47   :  { %558 = vmatmul.f32.gmra.mxu3 %v1097_v7 }
  0x48   :  { %219 = vmatmul.f32.gmra.mxu0 %v1095_v6 }
  0x49   :  { %332 = vmatmul.f32.gmra.mxu1 %v1097_v7 }
  0x4e   :  { %448 = vmatmul.f32.gmra.mxu2 %v1103_v8 }
  0x4f   :  { %561 = vmatmul.f32.gmra.mxu3 %v1105_v9 }
  0x50   :  { %222 = vmatmul.f32.gmra.mxu0 %v1103_v8 }
  0x51   :  { %335 = vmatmul.f32.gmra.mxu1 %v1105_v9 }
  0x56   :  { %451 = vmatmul.f32.gmra.mxu2 %v1111_v10 }
  0x57   :  { %564 = vmatmul.f32.gmra.mxu3 %v1113_v11 }
  0x58   :  { %225 = vmatmul.f32.gmra.mxu0 %v1111_v10 }
  0x59   :  { %338 = vmatmul.f32.gmra.mxu1 %v1113_v11 }
  0x5e   :  { %454 = vmatmul.f32.gmra.mxu2 %v1119_v12 }
  0x5f   :  { %567 = vmatmul.f32.gmra.mxu3 %v1121_v13 }
  0x60   :  { %228 = vmatmul.f32.gmra.mxu0 %v1119_v12 }
  0x61   :  { %341 = vmatmul.f32.gmra.mxu1 %v1121_v13 }
  0x66   :  { %457 = vmatmul.f32.gmra.mxu2 %v1127_v14 }
  0x67   :  { %570 = vmatmul.f32.gmra.mxu3 %v1129_v15 }
  0x68   :  { %231 = vmatmul.f32.gmra.mxu0 %v1127_v14 }
  0x69   :  { %344 = vmatmul.f32.gmra.mxu1 %v1129_v15 }
  0x6e   :  { %460 = vmatmul.f32.gmra.mxu2 %v1135_v16 }
  0x6f   :  { %573 = vmatmul.f32.gmra.mxu3 %v1137_v17 }
  0x70   :  { %234 = vmatmul.f32.gmra.mxu0 %v1135_v16 }
  0x71   :  { %347 = vmatmul.f32.gmra.mxu1 %v1137_v17 }
  0x76   :  { %463 = vmatmul.f32.gmra.mxu2 %v1143_v18 }
  0x77   :  { %576 = vmatmul.f32.gmra.mxu3 %v1145_v19 }
  0x78   :  { %237 = vmatmul.f32.gmra.mxu0 %v1143_v18 }
  0x79   :  { %350 = vmatmul.f32.gmra.mxu1 %v1145_v19 }
  0x7e   :  { %466 = vmatmul.f32.gmra.mxu2 %v1151_v20 }
  0x7f   :  { %579 = vmatmul.f32.gmra.mxu3 %v1153_v21 }
  0x80   :  { %240 = vmatmul.f32.gmra.mxu0 %v1151_v20 }
  0x81   :  { %353 = vmatmul.f32.gmra.mxu1 %v1153_v21 }
  0x86   :  { %469 = vmatmul.f32.gmra.mxu2 %v1159_v22 }
  0x87   :  { %582 = vmatmul.f32.gmra.mxu3 %v1161_v23 }
  0x88   :  { %243 = vmatmul.f32.gmra.mxu0 %v1159_v22 }
  0x89   :  { %356 = vmatmul.f32.gmra.mxu1 %v1161_v23 }
  0x8e   :  { %472 = vmatmul.f32.gmra.mxu2 %v1167_v24 }
  0x8f   :  { %585 = vmatmul.f32.gmra.mxu3 %v1169_v25 }
  0x90   :  { %246 = vmatmul.f32.gmra.mxu0 %v1167_v24 }
  0x91   :  { %359 = vmatmul.f32.gmra.mxu1 %v1169_v25 }
  0x96   :  { %475 = vmatmul.f32.gmra.mxu2 %v1175_v26 }
  0x97   :  { %588 = vmatmul.f32.gmra.mxu3 %v1177_v27 }
  0x98   :  { %249 = vmatmul.f32.gmra.mxu0 %v1175_v26 }
  0x99   :  { %362 = vmatmul.f32.gmra.mxu1 %v1177_v27 }
  0x9e   :  { %478 = vmatmul.f32.gmra.mxu2 %v1183_v28 }
  0x9f   :  { %591 = vmatmul.f32.gmra.mxu3 %v1185_v29 }
  0xa0   :  { %252 = vmatmul.f32.gmra.mxu0 %v1183_v28 }
  0xa1   :  { %365 = vmatmul.f32.gmra.mxu1 %v1185_v29 }
  0xa6   :  { %481 = vmatmul.f32.gmra.mxu2 %v1191_v30 }
  0xa7   :  { %594 = vmatmul.f32.gmra.mxu3 %v1193_v31 }
  0xa8   :  { %255 = vmatmul.f32.gmra.mxu0 %v1191_v30 }
  0xa9   :  { %368 = vmatmul.f32.gmra.mxu1 %v1193_v31 }
  0xad   :  { %v211_v36 = vpop.f32.mrf.mxu0 }
  0xae   :  { %484 = vmatmul.f32.gmra.mxu2 %v1201_v34  ;;  %v212_v37 = vadd.f32 %v211_v36, %v1199_v33  ;;  %v324_v39 = vpop.f32.mrf.mxu1 }
  0xaf   :  { %597 = vmatmul.f32.gmra.mxu3 %v1203_v35 }
  0xb0   :  { %v325_v40 = vadd.f32 %v324_v39, %v212_v37  ;;  %258 = vmatmul.f32.gmra.mxu0 %v1201_v34 }
  0xb1   :  { %v437_v41 = vpop.f32.mrf.mxu2  ;;  %371 = vmatmul.f32.gmra.mxu1 %v1203_v35 }
  0xb2   :  { %v550_v42 = vpop.f32.mrf.mxu3  ;;  %v646_v43 = vmul.f32 0.01, %v325_v40  ;;  %v438_v44 = vadd.f32 %v437_v41, %v1208_v38 }
  0xb4   :  { %v710_v47 = vmax.f32 %v325_v40, %v646_v43  ;;  %v551_v48 = vadd.f32 %v550_v42, %v438_v44 }
  0xb5   :  { %v214_v49 = vpop.f32.mrf.mxu0 }
  0xb6   :  { %v774_v50 = vadd.f32 %v710_v47, %v1071_v61  ;;  %v647_v51 = vmul.f32 0.01, %v551_v48  ;;  %487 = vmatmul.f32.gmra.mxu2 %v1213_v45  ;;  %v215_v52 = vadd.f32 %v214_v49, %v1199_v33  ;;  %v327_v53 = vpop.f32.mrf.mxu1  ;;  %v1225_v61 = vld [vmem:[#allocation2 + $0x120] sm:$0xff]  ;;  %v1239_v49 = vld [vmem:[#allocation2 + $0x138] sm:$0xff] }
  0xb7   :  { %600 = vmatmul.f32.gmra.mxu3 %v1215_v46 }
  0xb8   :  { %838 = vst [vmem:[#allocation8] sm:$0xff] %v774_v50  ;;  %v711_v54 = vmax.f32 %v551_v48, %v647_v51  ;;  %v328_v55 = vadd.f32 %v327_v53, %v215_v52  ;;  %261 = vmatmul.f32.gmra.mxu0 %v1213_v45  ;;  %v1237_v48 = vld [vmem:[#allocation2 + $0x130] sm:$0xff] }
  0xb9   :  { %v440_v56 = vpop.f32.mrf.mxu2  ;;  %374 = vmatmul.f32.gmra.mxu1 %v1215_v46 }
  0xba   :  { %v553_v57 = vpop.f32.mrf.mxu3  ;;  %v775_v58 = vadd.f32 %v711_v54, %v1073_v62  ;;  %v648_v59 = vmul.f32 0.01, %v328_v55  ;;  %v441_v60 = vadd.f32 %v440_v56, %v1208_v38 }
  0xbc   :  { %839 = vst [vmem:[#allocation8 + $0x8] sm:$0xff] %v775_v58  ;;  %v712_v0 = vmax.f32 %v328_v55, %v648_v59  ;;  %v554_v1 = vadd.f32 %v553_v57, %v441_v60 }
  0xbd   :  { %v217_v32 = vpop.f32.mrf.mxu0 }
  0xbe   :  { %v776_v36 = vadd.f32 %v712_v0, %v1079_v2  ;;  %v649_v37 = vmul.f32 0.01, %v554_v1  ;;  %490 = vmatmul.f32.gmra.mxu2 %v1225_v61  ;;  %v218_v62 = vadd.f32 %v217_v32, %v1199_v33  ;;  %v330_v39 = vpop.f32.mrf.mxu1  ;;  %v1251_v32 = vld [vmem:[#allocation2 + $0x148] sm:$0xff] }
  0xbf   :  { %603 = vmatmul.f32.gmra.mxu3 %v1227_v63 }
  0xc0   :  { %840 = vst [vmem:[#allocation8 + $0x10] sm:$0xff] %v776_v36  ;;  %v713_v40 = vmax.f32 %v554_v1, %v649_v37  ;;  %v331_v41 = vadd.f32 %v330_v39, %v218_v62  ;;  %264 = vmatmul.f32.gmra.mxu0 %v1225_v61  ;;  %v1249_v1 = vld [vmem:[#allocation2 + $0x140] sm:$0xff] }
  0xc1   :  { %v443_v42 = vpop.f32.mrf.mxu2  ;;  %377 = vmatmul.f32.gmra.mxu1 %v1227_v63 }
  0xc2   :  { %v556_v43 = vpop.f32.mrf.mxu3  ;;  %v777_v44 = vadd.f32 %v713_v40, %v1081_v3  ;;  %v650_v47 = vmul.f32 0.01, %v331_v41  ;;  %v444_v2 = vadd.f32 %v443_v42, %v1208_v38 }
  0xc4   :  { %841 = vst [vmem:[#allocation8 + $0x18] sm:$0xff] %v777_v44  ;;  %v714_v50 = vmax.f32 %v331_v41, %v650_v47  ;;  %v557_v51 = vadd.f32 %v556_v43, %v444_v2 }
  0xc5   :  { %v220_v52 = vpop.f32.mrf.mxu0 }
  0xc6   :  { %v778_v53 = vadd.f32 %v714_v50, %v1087_v4  ;;  %v651_v54 = vmul.f32 0.01, %v557_v51  ;;  %493 = vmatmul.f32.gmra.mxu2 %v1237_v48  ;;  %v221_v3 = vadd.f32 %v220_v52, %v1199_v33  ;;  %v333_v55 = vpop.f32.mrf.mxu1  ;;  %v1263_v52 = vld [vmem:[#allocation2 + $0x158] sm:$0xff] }
  0xc7   :  { %606 = vmatmul.f32.gmra.mxu3 %v1239_v49 }
  0xc8   :  { %842 = vst [vmem:[#allocation8 + $0x20] sm:$0xff] %v778_v53  ;;  %v715_v56 = vmax.f32 %v557_v51, %v651_v54  ;;  %v334_v57 = vadd.f32 %v333_v55, %v221_v3  ;;  %267 = vmatmul.f32.gmra.mxu0 %v1237_v48  ;;  %v1261_v51 = vld [vmem:[#allocation2 + $0x150] sm:$0xff] }
  0xc9   :  { %v446_v58 = vpop.f32.mrf.mxu2  ;;  %380 = vmatmul.f32.gmra.mxu1 %v1239_v49 }
  0xca   :  { %v559_v59 = vpop.f32.mrf.mxu3  ;;  %v779_v60 = vadd.f32 %v715_v56, %v1089_v5  ;;  %v652_v0 = vmul.f32 0.01, %v334_v57  ;;  %v447_v4 = vadd.f32 %v446_v58, %v1208_v38 }
  0xcc   :  { %843 = vst [vmem:[#allocation8 + $0x28] sm:$0xff] %v779_v60  ;;  %v716_v36 = vmax.f32 %v334_v57, %v652_v0  ;;  %v560_v37 = vadd.f32 %v559_v59, %v447_v4 }
  0xcd   :  { %v223_v62 = vpop.f32.mrf.mxu0 }
  0xce   :  { %v780_v39 = vadd.f32 %v716_v36, %v1095_v6  ;;  %v653_v40 = vmul.f32 0.01, %v560_v37  ;;  %496 = vmatmul.f32.gmra.mxu2 %v1249_v1  ;;  %v224_v5 = vadd.f32 %v223_v62, %v1199_v33  ;;  %v336_v41 = vpop.f32.mrf.mxu1  ;;  %v1275_v62 = vld [vmem:[#allocation2 + $0x168] sm:$0xff] }
  0xcf   :  { %609 = vmatmul.f32.gmra.mxu3 %v1251_v32 }
  0xd0   :  { %844 = vst [vmem:[#allocation8 + $0x30] sm:$0xff] %v780_v39  ;;  %v717_v42 = vmax.f32 %v560_v37, %v653_v40  ;;  %v337_v43 = vadd.f32 %v336_v41, %v224_v5  ;;  %270 = vmatmul.f32.gmra.mxu0 %v1249_v1  ;;  %v1273_v37 = vld [vmem:[#allocation2 + $0x160] sm:$0xff] }
  0xd1   :  { %v449_v44 = vpop.f32.mrf.mxu2  ;;  %383 = vmatmul.f32.gmra.mxu1 %v1251_v32 }
  0xd2   :  { %v562_v47 = vpop.f32.mrf.mxu3  ;;  %v781_v2 = vadd.f32 %v717_v42, %v1097_v7  ;;  %v654_v50 = vmul.f32 0.01, %v337_v43  ;;  %v450_v6 = vadd.f32 %v449_v44, %v1208_v38 }
  0xd4   :  { %845 = vst [vmem:[#allocation8 + $0x38] sm:$0xff] %v781_v2  ;;  %v718_v53 = vmax.f32 %v337_v43, %v654_v50  ;;  %v563_v54 = vadd.f32 %v562_v47, %v450_v6 }
  0xd5   :  { %v226_v3 = vpop.f32.mrf.mxu0 }
  0xd6   :  { %v782_v55 = vadd.f32 %v718_v53, %v1103_v8  ;;  %v655_v56 = vmul.f32 0.01, %v563_v54  ;;  %499 = vmatmul.f32.gmra.mxu2 %v1261_v51  ;;  %v227_v7 = vadd.f32 %v226_v3, %v1199_v33  ;;  %v339_v57 = vpop.f32.mrf.mxu1  ;;  %v1287_v3 = vld [vmem:[#allocation2 + $0x178] sm:$0xff] }
  0xd7   :  { %612 = vmatmul.f32.gmra.mxu3 %v1263_v52 }
  0xd8   :  { %846 = vst [vmem:[#allocation8 + $0x40] sm:$0xff] %v782_v55  ;;  %v719_v58 = vmax.f32 %v563_v54, %v655_v56  ;;  %v340_v59 = vadd.f32 %v339_v57, %v227_v7  ;;  %273 = vmatmul.f32.gmra.mxu0 %v1261_v51  ;;  %v1285_v54 = vld [vmem:[#allocation2 + $0x170] sm:$0xff] }
  0xd9   :  { %v452_v60 = vpop.f32.mrf.mxu2  ;;  %386 = vmatmul.f32.gmra.mxu1 %v1263_v52 }
  0xda   :  { %v565_v0 = vpop.f32.mrf.mxu3  ;;  %v783_v4 = vadd.f32 %v719_v58, %v1105_v9  ;;  %v656_v36 = vmul.f32 0.01, %v340_v59  ;;  %v453_v8 = vadd.f32 %v452_v60, %v1208_v38 }
  0xdc   :  { %847 = vst [vmem:[#allocation8 + $0x48] sm:$0xff] %v783_v4  ;;  %v720_v39 = vmax.f32 %v340_v59, %v656_v36  ;;  %v566_v40 = vadd.f32 %v565_v0, %v453_v8 }
  0xdd   :  { %v229_v5 = vpop.f32.mrf.mxu0 }
  0xde   :  { %v784_v41 = vadd.f32 %v720_v39, %v1111_v10  ;;  %v657_v42 = vmul.f32 0.01, %v566_v40  ;;  %502 = vmatmul.f32.gmra.mxu2 %v1273_v37  ;;  %v230_v9 = vadd.f32 %v229_v5, %v1199_v33  ;;  %v342_v43 = vpop.f32.mrf.mxu1  ;;  %v1299_v5 = vld [vmem:[#allocation2 + $0x188] sm:$0xff] }
  0xdf   :  { %615 = vmatmul.f32.gmra.mxu3 %v1275_v62 }
  0xe0   :  { %848 = vst [vmem:[#allocation8 + $0x50] sm:$0xff] %v784_v41  ;;  %v721_v44 = vmax.f32 %v566_v40, %v657_v42  ;;  %v343_v47 = vadd.f32 %v342_v43, %v230_v9  ;;  %276 = vmatmul.f32.gmra.mxu0 %v1273_v37  ;;  %v1297_v40 = vld [vmem:[#allocation2 + $0x180] sm:$0xff] }
  0xe1   :  { %v455_v2 = vpop.f32.mrf.mxu2  ;;  %389 = vmatmul.f32.gmra.mxu1 %v1275_v62 }
  0xe2   :  { %v568_v50 = vpop.f32.mrf.mxu3  ;;  %v785_v6 = vadd.f32 %v721_v44, %v1113_v11  ;;  %v658_v53 = vmul.f32 0.01, %v343_v47  ;;  %v456_v10 = vadd.f32 %v455_v2, %v1208_v38 }
  0xe4   :  { %849 = vst [vmem:[#allocation8 + $0x58] sm:$0xff] %v785_v6  ;;  %v722_v55 = vmax.f32 %v343_v47, %v658_v53  ;;  %v569_v56 = vadd.f32 %v568_v50, %v456_v10 }
  0xe5   :  { %v232_v7 = vpop.f32.mrf.mxu0 }
  0xe6   :  { %v786_v57 = vadd.f32 %v722_v55, %v1119_v12  ;;  %v659_v58 = vmul.f32 0.01, %v569_v56  ;;  %505 = vmatmul.f32.gmra.mxu2 %v1285_v54  ;;  %v233_v11 = vadd.f32 %v232_v7, %v1199_v33  ;;  %v345_v59 = vpop.f32.mrf.mxu1  ;;  %v1311_v7 = vld [vmem:[#allocation2 + $0x198] sm:$0xff] }
  0xe7   :  { %618 = vmatmul.f32.gmra.mxu3 %v1287_v3 }
  0xe8   :  { %850 = vst [vmem:[#allocation8 + $0x60] sm:$0xff] %v786_v57  ;;  %v723_v60 = vmax.f32 %v569_v56, %v659_v58  ;;  %v346_v0 = vadd.f32 %v345_v59, %v233_v11  ;;  %279 = vmatmul.f32.gmra.mxu0 %v1285_v54  ;;  %v1309_v56 = vld [vmem:[#allocation2 + $0x190] sm:$0xff] }
  0xe9   :  { %v458_v4 = vpop.f32.mrf.mxu2  ;;  %392 = vmatmul.f32.gmra.mxu1 %v1287_v3 }
  0xea   :  { %v571_v36 = vpop.f32.mrf.mxu3  ;;  %v787_v8 = vadd.f32 %v723_v60, %v1121_v13  ;;  %v660_v39 = vmul.f32 0.01, %v346_v0  ;;  %v459_v12 = vadd.f32 %v458_v4, %v1208_v38 }
  0xec   :  { %851 = vst [vmem:[#allocation8 + $0x68] sm:$0xff] %v787_v8  ;;  %v724_v41 = vmax.f32 %v346_v0, %v660_v39  ;;  %v572_v42 = vadd.f32 %v571_v36, %v459_v12 }
  0xed   :  { %v235_v9 = vpop.f32.mrf.mxu0 }
  0xee   :  { %v788_v43 = vadd.f32 %v724_v41, %v1127_v14  ;;  %v661_v44 = vmul.f32 0.01, %v572_v42  ;;  %508 = vmatmul.f32.gmra.mxu2 %v1297_v40  ;;  %v236_v13 = vadd.f32 %v235_v9, %v1199_v33  ;;  %v348_v47 = vpop.f32.mrf.mxu1  ;;  %v1323_v9 = vld [vmem:[#allocation2 + $0x1a8] sm:$0xff] }
  0xef   :  { %621 = vmatmul.f32.gmra.mxu3 %v1299_v5 }
  0xf0   :  { %852 = vst [vmem:[#allocation8 + $0x70] sm:$0xff] %v788_v43  ;;  %v725_v2 = vmax.f32 %v572_v42, %v661_v44  ;;  %v349_v50 = vadd.f32 %v348_v47, %v236_v13  ;;  %282 = vmatmul.f32.gmra.mxu0 %v1297_v40  ;;  %v1321_v42 = vld [vmem:[#allocation2 + $0x1a0] sm:$0xff] }
  0xf1   :  { %v461_v6 = vpop.f32.mrf.mxu2  ;;  %395 = vmatmul.f32.gmra.mxu1 %v1299_v5 }
  0xf2   :  { %v574_v53 = vpop.f32.mrf.mxu3  ;;  %v789_v10 = vadd.f32 %v725_v2, %v1129_v15  ;;  %v662_v55 = vmul.f32 0.01, %v349_v50  ;;  %v462_v14 = vadd.f32 %v461_v6, %v1208_v38 }
  0xf4   :  { %853 = vst [vmem:[#allocation8 + $0x78] sm:$0xff] %v789_v10  ;;  %v726_v57 = vmax.f32 %v349_v50, %v662_v55  ;;  %v575_v58 = vadd.f32 %v574_v53, %v462_v14 }
  0xf5   :  { %v238_v11 = vpop.f32.mrf.mxu0 }
  0xf6   :  { %v790_v59 = vadd.f32 %v726_v57, %v1135_v16  ;;  %v663_v60 = vmul.f32 0.01, %v575_v58  ;;  %511 = vmatmul.f32.gmra.mxu2 %v1309_v56  ;;  %v239_v15 = vadd.f32 %v238_v11, %v1199_v33  ;;  %v351_v0 = vpop.f32.mrf.mxu1  ;;  %v1335_v11 = vld [vmem:[#allocation2 + $0x1b8] sm:$0xff] }
  0xf7   :  { %624 = vmatmul.f32.gmra.mxu3 %v1311_v7 }
  0xf8   :  { %854 = vst [vmem:[#allocation8 + $0x80] sm:$0xff] %v790_v59  ;;  %v727_v4 = vmax.f32 %v575_v58, %v663_v60  ;;  %v352_v36 = vadd.f32 %v351_v0, %v239_v15  ;;  %285 = vmatmul.f32.gmra.mxu0 %v1309_v56  ;;  %v1333_v58 = vld [vmem:[#allocation2 + $0x1b0] sm:$0xff] }
  0xf9   :  { %v464_v8 = vpop.f32.mrf.mxu2  ;;  %398 = vmatmul.f32.gmra.mxu1 %v1311_v7 }
  0xfa   :  { %v577_v39 = vpop.f32.mrf.mxu3  ;;  %v791_v12 = vadd.f32 %v727_v4, %v1137_v17  ;;  %v664_v41 = vmul.f32 0.01, %v352_v36  ;;  %v465_v16 = vadd.f32 %v464_v8, %v1208_v38 }
  0xfc   :  { %855 = vst [vmem:[#allocation8 + $0x88] sm:$0xff] %v791_v12  ;;  %v728_v43 = vmax.f32 %v352_v36, %v664_v41  ;;  %v578_v44 = vadd.f32 %v577_v39, %v465_v16 }
  0xfd   :  { %v241_v13 = vpop.f32.mrf.mxu0 }
  0xfe   :  { %v792_v47 = vadd.f32 %v728_v43, %v1143_v18  ;;  %v665_v2 = vmul.f32 0.01, %v578_v44  ;;  %514 = vmatmul.f32.gmra.mxu2 %v1321_v42  ;;  %v242_v17 = vadd.f32 %v241_v13, %v1199_v33  ;;  %v354_v50 = vpop.f32.mrf.mxu1  ;;  %v1347_v13 = vld [vmem:[#allocation2 + $0x1c8] sm:$0xff] }
  0xff   :  { %627 = vmatmul.f32.gmra.mxu3 %v1323_v9 }
 0x100   :  { %856 = vst [vmem:[#allocation8 + $0x90] sm:$0xff] %v792_v47  ;;  %v729_v6 = vmax.f32 %v578_v44, %v665_v2  ;;  %v355_v53 = vadd.f32 %v354_v50, %v242_v17  ;;  %288 = vmatmul.f32.gmra.mxu0 %v1321_v42  ;;  %v1345_v44 = vld [vmem:[#allocation2 + $0x1c0] sm:$0xff] }
 0x101   :  { %v467_v10 = vpop.f32.mrf.mxu2  ;;  %401 = vmatmul.f32.gmra.mxu1 %v1323_v9 }
 0x102   :  { %v580_v55 = vpop.f32.mrf.mxu3  ;;  %v793_v14 = vadd.f32 %v729_v6, %v1145_v19  ;;  %v666_v57 = vmul.f32 0.01, %v355_v53  ;;  %v468_v18 = vadd.f32 %v467_v10, %v1208_v38 }
 0x104   :  { %857 = vst [vmem:[#allocation8 + $0x98] sm:$0xff] %v793_v14  ;;  %v730_v59 = vmax.f32 %v355_v53, %v666_v57  ;;  %v581_v60 = vadd.f32 %v580_v55, %v468_v18 }
 0x105   :  { %v244_v15 = vpop.f32.mrf.mxu0 }
 0x106   :  { %v794_v0 = vadd.f32 %v730_v59, %v1151_v20  ;;  %v667_v4 = vmul.f32 0.01, %v581_v60  ;;  %517 = vmatmul.f32.gmra.mxu2 %v1333_v58  ;;  %v245_v19 = vadd.f32 %v244_v15, %v1199_v33  ;;  %v357_v36 = vpop.f32.mrf.mxu1  ;;  %v1359_v15 = vld [vmem:[#allocation2 + $0x1d8] sm:$0xff] }
 0x107   :  { %630 = vmatmul.f32.gmra.mxu3 %v1335_v11 }
 0x108   :  { %858 = vst [vmem:[#allocation8 + $0xa0] sm:$0xff] %v794_v0  ;;  %v731_v8 = vmax.f32 %v581_v60, %v667_v4  ;;  %v358_v39 = vadd.f32 %v357_v36, %v245_v19  ;;  %291 = vmatmul.f32.gmra.mxu0 %v1333_v58  ;;  %v1357_v60 = vld [vmem:[#allocation2 + $0x1d0] sm:$0xff] }
 0x109   :  { %v470_v12 = vpop.f32.mrf.mxu2  ;;  %404 = vmatmul.f32.gmra.mxu1 %v1335_v11 }
 0x10a   :  { %v583_v41 = vpop.f32.mrf.mxu3  ;;  %v795_v16 = vadd.f32 %v731_v8, %v1153_v21  ;;  %v668_v43 = vmul.f32 0.01, %v358_v39  ;;  %v471_v20 = vadd.f32 %v470_v12, %v1208_v38 }
 0x10c   :  { %859 = vst [vmem:[#allocation8 + $0xa8] sm:$0xff] %v795_v16  ;;  %v732_v47 = vmax.f32 %v358_v39, %v668_v43  ;;  %v584_v2 = vadd.f32 %v583_v41, %v471_v20 }
 0x10d   :  { %v247_v17 = vpop.f32.mrf.mxu0 }
 0x10e   :  { %v796_v50 = vadd.f32 %v732_v47, %v1159_v22  ;;  %v669_v6 = vmul.f32 0.01, %v584_v2  ;;  %520 = vmatmul.f32.gmra.mxu2 %v1345_v44  ;;  %v248_v21 = vadd.f32 %v247_v17, %v1199_v33  ;;  %v360_v53 = vpop.f32.mrf.mxu1  ;;  %v1371_v17 = vld [vmem:[#allocation2 + $0x1e8] sm:$0xff] }
 0x10f   :  { %633 = vmatmul.f32.gmra.mxu3 %v1347_v13 }
 0x110   :  { %860 = vst [vmem:[#allocation8 + $0xb0] sm:$0xff] %v796_v50  ;;  %v733_v10 = vmax.f32 %v584_v2, %v669_v6  ;;  %v361_v55 = vadd.f32 %v360_v53, %v248_v21  ;;  %294 = vmatmul.f32.gmra.mxu0 %v1345_v44  ;;  %v1369_v2 = vld [vmem:[#allocation2 + $0x1e0] sm:$0xff] }
 0x111   :  { %v473_v14 = vpop.f32.mrf.mxu2  ;;  %407 = vmatmul.f32.gmra.mxu1 %v1347_v13 }
 0x112   :  { %v586_v57 = vpop.f32.mrf.mxu3  ;;  %v797_v18 = vadd.f32 %v733_v10, %v1161_v23  ;;  %v670_v59 = vmul.f32 0.01, %v361_v55  ;;  %v474_v22 = vadd.f32 %v473_v14, %v1208_v38 }
 0x114   :  { %861 = vst [vmem:[#allocation8 + $0xb8] sm:$0xff] %v797_v18  ;;  %v734_v0 = vmax.f32 %v361_v55, %v670_v59  ;;  %v587_v4 = vadd.f32 %v586_v57, %v474_v22 }
 0x115   :  { %v250_v19 = vpop.f32.mrf.mxu0 }
 0x116   :  { %v798_v36 = vadd.f32 %v734_v0, %v1167_v24  ;;  %v671_v8 = vmul.f32 0.01, %v587_v4  ;;  %523 = vmatmul.f32.gmra.mxu2 %v1357_v60  ;;  %v251_v23 = vadd.f32 %v250_v19, %v1199_v33  ;;  %v363_v39 = vpop.f32.mrf.mxu1  ;;  %v1383_v19 = vld [vmem:[#allocation2 + $0x1f8] sm:$0xff] }
 0x117   :  { %636 = vmatmul.f32.gmra.mxu3 %v1359_v15 }
 0x118   :  { %862 = vst [vmem:[#allocation8 + $0xc0] sm:$0xff] %v798_v36  ;;  %v735_v12 = vmax.f32 %v587_v4, %v671_v8  ;;  %v364_v41 = vadd.f32 %v363_v39, %v251_v23  ;;  %297 = vmatmul.f32.gmra.mxu0 %v1357_v60  ;;  %v1381_v4 = vld [vmem:[#allocation2 + $0x1f0] sm:$0xff] }
 0x119   :  { %v476_v16 = vpop.f32.mrf.mxu2  ;;  %410 = vmatmul.f32.gmra.mxu1 %v1359_v15 }
 0x11a   :  { %v589_v43 = vpop.f32.mrf.mxu3  ;;  %v799_v20 = vadd.f32 %v735_v12, %v1169_v25  ;;  %v672_v47 = vmul.f32 0.01, %v364_v41  ;;  %v477_v24 = vadd.f32 %v476_v16, %v1208_v38 }
 0x11c   :  { %863 = vst [vmem:[#allocation8 + $0xc8] sm:$0xff] %v799_v20  ;;  %v736_v50 = vmax.f32 %v364_v41, %v672_v47  ;;  %v590_v6 = vadd.f32 %v589_v43, %v477_v24 }
 0x11d   :  { %v253_v21 = vpop.f32.mrf.mxu0 }
 0x11e   :  { %v800_v53 = vadd.f32 %v736_v50, %v1175_v26  ;;  %v673_v10 = vmul.f32 0.01, %v590_v6  ;;  %526 = vmatmul.f32.gmra.mxu2 %v1369_v2  ;;  %v254_v25 = vadd.f32 %v253_v21, %v1199_v33  ;;  %v366_v55 = vpop.f32.mrf.mxu1 }
 0x11f   :  { %639 = vmatmul.f32.gmra.mxu3 %v1371_v17 }
 0x120   :  { %864 = vst [vmem:[#allocation8 + $0xd0] sm:$0xff] %v800_v53  ;;  %v737_v14 = vmax.f32 %v590_v6, %v673_v10  ;;  %v367_v57 = vadd.f32 %v366_v55, %v254_v25  ;;  %300 = vmatmul.f32.gmra.mxu0 %v1369_v2 }
 0x121   :  { %v479_v18 = vpop.f32.mrf.mxu2  ;;  %413 = vmatmul.f32.gmra.mxu1 %v1371_v17 }
 0x122   :  { %v592_v59 = vpop.f32.mrf.mxu3  ;;  %v801_v22 = vadd.f32 %v737_v14, %v1177_v27  ;;  %v674_v0 = vmul.f32 0.01, %v367_v57  ;;  %v480_v26 = vadd.f32 %v479_v18, %v1208_v38 }
 0x124   :  { %865 = vst [vmem:[#allocation8 + $0xd8] sm:$0xff] %v801_v22  ;;  %v738_v36 = vmax.f32 %v367_v57, %v674_v0  ;;  %v593_v8 = vadd.f32 %v592_v59, %v480_v26 }
 0x125   :  { %v256_v23 = vpop.f32.mrf.mxu0 }
 0x126   :  { %v802_v39 = vadd.f32 %v738_v36, %v1183_v28  ;;  %v675_v12 = vmul.f32 0.01, %v593_v8  ;;  %529 = vmatmul.f32.gmra.mxu2 %v1381_v4  ;;  %v257_v27 = vadd.f32 %v256_v23, %v1199_v33  ;;  %v369_v41 = vpop.f32.mrf.mxu1 }
 0x127   :  { %642 = vmatmul.f32.gmra.mxu3 %v1383_v19 }
 0x128   :  { %866 = vst [vmem:[#allocation8 + $0xe0] sm:$0xff] %v802_v39  ;;  %v739_v16 = vmax.f32 %v593_v8, %v675_v12  ;;  %v370_v43 = vadd.f32 %v369_v41, %v257_v27  ;;  %303 = vmatmul.f32.gmra.mxu0 %v1381_v4 }
 0x129   :  { %v482_v20 = vpop.f32.mrf.mxu2  ;;  %416 = vmatmul.f32.gmra.mxu1 %v1383_v19 }
 0x12a   :  { %v595_v47 = vpop.f32.mrf.mxu3  ;;  %v803_v24 = vadd.f32 %v739_v16, %v1185_v29  ;;  %v676_v50 = vmul.f32 0.01, %v370_v43  ;;  %v483_v28 = vadd.f32 %v482_v20, %v1208_v38 }
 0x12c   :  { %867 = vst [vmem:[#allocation8 + $0xe8] sm:$0xff] %v803_v24  ;;  %v740_v6 = vmax.f32 %v370_v43, %v676_v50  ;;  %v596_v21 = vadd.f32 %v595_v47, %v483_v28 }
 0x12d   :  { %v259_v53 = vpop.f32.mrf.mxu0 }
 0x12e   :  { %v804_v10 = vadd.f32 %v740_v6, %v1191_v30  ;;  %v677_v25 = vmul.f32 0.01, %v596_v21  ;;  %v260_v55 = vadd.f32 %v259_v53, %v1199_v33  ;;  %v372_v14 = vpop.f32.mrf.mxu1 }
 0x130   :  { %868 = vst [vmem:[#allocation8 + $0xf0] sm:$0xff] %v804_v10  ;;  %v741_v57 = vmax.f32 %v596_v21, %v677_v25  ;;  %v373_v18 = vadd.f32 %v372_v14, %v260_v55 }
 0x131   :  { %v485_v59 = vpop.f32.mrf.mxu2 }
 0x132   :  { %v598_v29 = vpop.f32.mrf.mxu3  ;;  %v805_v22 = vadd.f32 %v741_v57, %v1193_v31  ;;  %v678_v0 = vmul.f32 0.01, %v373_v18  ;;  %v486_v26 = vadd.f32 %v485_v59, %v1208_v38 }
 0x134   :  { %869 = vst [vmem:[#allocation8 + $0xf8] sm:$0xff] %v805_v22  ;;  %v742_v36 = vmax.f32 %v373_v18, %v678_v0  ;;  %v599_v8 = vadd.f32 %v598_v29, %v486_v26 }
 0x135   :  { %v262_v23 = vpop.f32.mrf.mxu0 }
 0x136   :  { %v806_v30 = vadd.f32 %v742_v36, %v1201_v34  ;;  %v679_v39 = vmul.f32 0.01, %v599_v8  ;;  %v263_v12 = vadd.f32 %v262_v23, %v1199_v33  ;;  %v375_v27 = vpop.f32.mrf.mxu1 }
 0x138   :  { %870 = vst [vmem:[#allocation8 + $0x100] sm:$0xff] %v806_v30  ;;  %v743_v41 = vmax.f32 %v599_v8, %v679_v39  ;;  %v376_v16 = vadd.f32 %v375_v27, %v263_v12 }
 0x139   :  { %v488_v43 = vpop.f32.mrf.mxu2 }
 0x13a   :  { %v601_v20 = vpop.f32.mrf.mxu3  ;;  %v807_v31 = vadd.f32 %v743_v41, %v1203_v35  ;;  %v680_v47 = vmul.f32 0.01, %v376_v16  ;;  %v489_v24 = vadd.f32 %v488_v43, %v1208_v38 }
 0x13c   :  { %871 = vst [vmem:[#allocation8 + $0x108] sm:$0xff] %v807_v31  ;;  %v744_v50 = vmax.f32 %v376_v16, %v680_v47  ;;  %v602_v28 = vadd.f32 %v601_v20, %v489_v24 }
 0x13d   :  { %v265_v6 = vpop.f32.mrf.mxu0 }
 0x13e   :  { %v808_v34 = vadd.f32 %v744_v50, %v1213_v45  ;;  %v681_v21 = vmul.f32 0.01, %v602_v28  ;;  %v266_v53 = vadd.f32 %v265_v6, %v1199_v33  ;;  %v378_v10 = vpop.f32.mrf.mxu1 }
 0x140   :  { %872 = vst [vmem:[#allocation8 + $0x110] sm:$0xff] %v808_v34  ;;  %v745_v25 = vmax.f32 %v602_v28, %v681_v21  ;;  %v379_v55 = vadd.f32 %v378_v10, %v266_v53 }
 0x141   :  { %v491_v14 = vpop.f32.mrf.mxu2 }
 0x142   :  { %v604_v57 = vpop.f32.mrf.mxu3  ;;  %v809_v35 = vadd.f32 %v745_v25, %v1215_v46  ;;  %v682_v18 = vmul.f32 0.01, %v379_v55  ;;  %v492_v59 = vadd.f32 %v491_v14, %v1208_v38 }
 0x144   :  { %873 = vst [vmem:[#allocation8 + $0x118] sm:$0xff] %v809_v35  ;;  %v746_v29 = vmax.f32 %v379_v55, %v682_v18  ;;  %v605_v22 = vadd.f32 %v604_v57, %v492_v59 }
 0x145   :  { %v268_v0 = vpop.f32.mrf.mxu0 }
 0x146   :  { %v810_v45 = vadd.f32 %v746_v29, %v1225_v61  ;;  %v683_v26 = vmul.f32 0.01, %v605_v22  ;;  %v269_v36 = vadd.f32 %v268_v0, %v1199_v33  ;;  %v381_v8 = vpop.f32.mrf.mxu1 }
 0x148   :  { %874 = vst [vmem:[#allocation8 + $0x120] sm:$0xff] %v810_v45  ;;  %v747_v23 = vmax.f32 %v605_v22, %v683_v26  ;;  %v382_v30 = vadd.f32 %v381_v8, %v269_v36 }
 0x149   :  { %v494_v39 = vpop.f32.mrf.mxu2 }
 0x14a   :  { %v607_v12 = vpop.f32.mrf.mxu3  ;;  %v811_v46 = vadd.f32 %v747_v23, %v1227_v63  ;;  %v684_v27 = vmul.f32 0.01, %v382_v30  ;;  %v495_v41 = vadd.f32 %v494_v39, %v1208_v38 }
 0x14c   :  { %875 = vst [vmem:[#allocation8 + $0x128] sm:$0xff] %v811_v46  ;;  %v748_v16 = vmax.f32 %v382_v30, %v684_v27  ;;  %v608_v43 = vadd.f32 %v607_v12, %v495_v41 }
 0x14d   :  { %v271_v20 = vpop.f32.mrf.mxu0 }
 0x14e   :  { %v812_v61 = vadd.f32 %v748_v16, %v1237_v48  ;;  %v685_v31 = vmul.f32 0.01, %v608_v43  ;;  %v272_v47 = vadd.f32 %v271_v20, %v1199_v33  ;;  %v384_v24 = vpop.f32.mrf.mxu1 }
 0x150   :  { %876 = vst [vmem:[#allocation8 + $0x130] sm:$0xff] %v812_v61  ;;  %v749_v50 = vmax.f32 %v608_v43, %v685_v31  ;;  %v385_v28 = vadd.f32 %v384_v24, %v272_v47 }
 0x151   :  { %v497_v6 = vpop.f32.mrf.mxu2 }
 0x152   :  { %v610_v34 = vpop.f32.mrf.mxu3  ;;  %v813_v63 = vadd.f32 %v749_v50, %v1239_v49  ;;  %v686_v21 = vmul.f32 0.01, %v385_v28  ;;  %v498_v53 = vadd.f32 %v497_v6, %v1208_v38 }
 0x154   :  { %877 = vst [vmem:[#allocation8 + $0x138] sm:$0xff] %v813_v63  ;;  %v750_v10 = vmax.f32 %v385_v28, %v686_v21  ;;  %v611_v25 = vadd.f32 %v610_v34, %v498_v53 }
 0x155   :  { %v274_v55 = vpop.f32.mrf.mxu0 }
 0x156   :  { %v814_v48 = vadd.f32 %v750_v10, %v1249_v1  ;;  %v687_v14 = vmul.f32 0.01, %v611_v25  ;;  %v275_v57 = vadd.f32 %v274_v55, %v1199_v33  ;;  %v387_v35 = vpop.f32.mrf.mxu1 }
 0x158   :  { %878 = vst [vmem:[#allocation8 + $0x140] sm:$0xff] %v814_v48  ;;  %v751_v18 = vmax.f32 %v611_v25, %v687_v14  ;;  %v388_v59 = vadd.f32 %v387_v35, %v275_v57 }
 0x159   :  { %v500_v29 = vpop.f32.mrf.mxu2 }
 0x15a   :  { %v613_v22 = vpop.f32.mrf.mxu3  ;;  %v815_v49 = vadd.f32 %v751_v18, %v1251_v32  ;;  %v688_v0 = vmul.f32 0.01, %v388_v59  ;;  %v501_v45 = vadd.f32 %v500_v29, %v1208_v38 }
 0x15c   :  { %879 = vst [vmem:[#allocation8 + $0x148] sm:$0xff] %v815_v49  ;;  %v752_v26 = vmax.f32 %v388_v59, %v688_v0  ;;  %v614_v36 = vadd.f32 %v613_v22, %v501_v45 }
 0x15d   :  { %v277_v8 = vpop.f32.mrf.mxu0 }
 0x15e   :  { %v816_v1 = vadd.f32 %v752_v26, %v1261_v51  ;;  %v689_v23 = vmul.f32 0.01, %v614_v36  ;;  %v278_v30 = vadd.f32 %v277_v8, %v1199_v33  ;;  %v390_v39 = vpop.f32.mrf.mxu1 }
 0x160   :  { %880 = vst [vmem:[#allocation8 + $0x150] sm:$0xff] %v816_v1  ;;  %v753_v12 = vmax.f32 %v614_v36, %v689_v23  ;;  %v391_v46 = vadd.f32 %v390_v39, %v278_v30 }
 0x161   :  { %v503_v27 = vpop.f32.mrf.mxu2 }
 0x162   :  { %v616_v41 = vpop.f32.mrf.mxu3  ;;  %v817_v32 = vadd.f32 %v753_v12, %v1263_v52  ;;  %v690_v16 = vmul.f32 0.01, %v391_v46  ;;  %v504_v43 = vadd.f32 %v503_v27, %v1208_v38 }
 0x164   :  { %881 = vst [vmem:[#allocation8 + $0x158] sm:$0xff] %v817_v32  ;;  %v754_v20 = vmax.f32 %v391_v46, %v690_v16  ;;  %v617_v61 = vadd.f32 %v616_v41, %v504_v43 }
 0x165   :  { %v280_v31 = vpop.f32.mrf.mxu0 }
 0x166   :  { %v818_v51 = vadd.f32 %v754_v20, %v1273_v37  ;;  %v691_v47 = vmul.f32 0.01, %v617_v61  ;;  %v281_v24 = vadd.f32 %v280_v31, %v1199_v33  ;;  %v393_v50 = vpop.f32.mrf.mxu1 }
 0x168   :  { %882 = vst [vmem:[#allocation8 + $0x160] sm:$0xff] %v818_v51  ;;  %v755_v28 = vmax.f32 %v617_v61, %v691_v47  ;;  %v394_v6 = vadd.f32 %v393_v50, %v281_v24 }
 0x169   :  { %v506_v34 = vpop.f32.mrf.mxu2 }
 0x16a   :  { %v619_v63 = vpop.f32.mrf.mxu3  ;;  %v819_v52 = vadd.f32 %v755_v28, %v1275_v62  ;;  %v692_v21 = vmul.f32 0.01, %v394_v6  ;;  %v507_v53 = vadd.f32 %v506_v34, %v1208_v38 }
 0x16c   :  { %883 = vst [vmem:[#allocation8 + $0x168] sm:$0xff] %v819_v52  ;;  %v756_v10 = vmax.f32 %v394_v6, %v692_v21  ;;  %v620_v25 = vadd.f32 %v619_v63, %v507_v53 }
 0x16d   :  { %v283_v55 = vpop.f32.mrf.mxu0 }
 0x16e   :  { %v820_v37 = vadd.f32 %v756_v10, %v1285_v54  ;;  %v693_v48 = vmul.f32 0.01, %v620_v25  ;;  %v284_v14 = vadd.f32 %v283_v55, %v1199_v33  ;;  %v396_v57 = vpop.f32.mrf.mxu1 }
 0x170   :  { %884 = vst [vmem:[#allocation8 + $0x170] sm:$0xff] %v820_v37  ;;  %v757_v35 = vmax.f32 %v620_v25, %v693_v48  ;;  %v397_v18 = vadd.f32 %v396_v57, %v284_v14 }
 0x171   :  { %v509_v59 = vpop.f32.mrf.mxu2 }
 0x172   :  { %v622_v29 = vpop.f32.mrf.mxu3  ;;  %v821_v62 = vadd.f32 %v757_v35, %v1287_v3  ;;  %v694_v22 = vmul.f32 0.01, %v397_v18  ;;  %v510_v49 = vadd.f32 %v509_v59, %v1208_v38 }
 0x174   :  { %885 = vst [vmem:[#allocation8 + $0x178] sm:$0xff] %v821_v62  ;;  %v758_v0 = vmax.f32 %v397_v18, %v694_v22  ;;  %v623_v45 = vadd.f32 %v622_v29, %v510_v49 }
 0x175   :  { %v286_v26 = vpop.f32.mrf.mxu0 }
 0x176   :  { %v822_v54 = vadd.f32 %v758_v0, %v1297_v40  ;;  %v695_v36 = vmul.f32 0.01, %v623_v45  ;;  %v287_v8 = vadd.f32 %v286_v26, %v1199_v33  ;;  %v399_v1 = vpop.f32.mrf.mxu1 }
 0x178   :  { %886 = vst [vmem:[#allocation8 + $0x180] sm:$0xff] %v822_v54  ;;  %v759_v23 = vmax.f32 %v623_v45, %v695_v36  ;;  %v400_v30 = vadd.f32 %v399_v1, %v287_v8 }
 0x179   :  { %v512_v39 = vpop.f32.mrf.mxu2 }
 0x17a   :  { %v625_v12 = vpop.f32.mrf.mxu3  ;;  %v823_v3 = vadd.f32 %v759_v23, %v1299_v5  ;;  %v696_v46 = vmul.f32 0.01, %v400_v30  ;;  %v513_v27 = vadd.f32 %v512_v39, %v1208_v38 }
 0x17c   :  { %887 = vst [vmem:[#allocation8 + $0x188] sm:$0xff] %v823_v3  ;;  %v760_v41 = vmax.f32 %v400_v30, %v696_v46  ;;  %v626_v32 = vadd.f32 %v625_v12, %v513_v27 }
 0x17d   :  { %v289_v16 = vpop.f32.mrf.mxu0 }
 0x17e   :  { %v824_v40 = vadd.f32 %v760_v41, %v1309_v56  ;;  %v697_v43 = vmul.f32 0.01, %v626_v32  ;;  %v290_v20 = vadd.f32 %v289_v16, %v1199_v33  ;;  %v402_v61 = vpop.f32.mrf.mxu1 }
 0x180   :  { %888 = vst [vmem:[#allocation8 + $0x190] sm:$0xff] %v824_v40  ;;  %v761_v31 = vmax.f32 %v626_v32, %v697_v43  ;;  %v403_v51 = vadd.f32 %v402_v61, %v290_v20 }
 0x181   :  { %v515_v47 = vpop.f32.mrf.mxu2 }
 0x182   :  { %v628_v24 = vpop.f32.mrf.mxu3  ;;  %v825_v5 = vadd.f32 %v761_v31, %v1311_v7  ;;  %v698_v50 = vmul.f32 0.01, %v403_v51  ;;  %v516_v28 = vadd.f32 %v515_v47, %v1208_v38 }
 0x184   :  { %889 = vst [vmem:[#allocation8 + $0x198] sm:$0xff] %v825_v5  ;;  %v762_v6 = vmax.f32 %v403_v51, %v698_v50  ;;  %v629_v34 = vadd.f32 %v628_v24, %v516_v28 }
 0x185   :  { %v292_v63 = vpop.f32.mrf.mxu0 }
 0x186   :  { %v826_v56 = vadd.f32 %v762_v6, %v1321_v42  ;;  %v699_v52 = vmul.f32 0.01, %v629_v34  ;;  %v293_v21 = vadd.f32 %v292_v63, %v1199_v33  ;;  %v405_v53 = vpop.f32.mrf.mxu1 }
 0x188   :  { %890 = vst [vmem:[#allocation8 + $0x1a0] sm:$0xff] %v826_v56  ;;  %v763_v10 = vmax.f32 %v629_v34, %v699_v52  ;;  %v406_v25 = vadd.f32 %v405_v53, %v293_v21 }
 0x189   :  { %v518_v55 = vpop.f32.mrf.mxu2 }
 0x18a   :  { %v631_v37 = vpop.f32.mrf.mxu3  ;;  %v827_v7 = vadd.f32 %v763_v10, %v1323_v9  ;;  %v700_v48 = vmul.f32 0.01, %v406_v25  ;;  %v519_v14 = vadd.f32 %v518_v55, %v1208_v38 }
 0x18c   :  { %891 = vst [vmem:[#allocation8 + $0x1a8] sm:$0xff] %v827_v7  ;;  %v764_v57 = vmax.f32 %v406_v25, %v700_v48  ;;  %v632_v35 = vadd.f32 %v631_v37, %v519_v14 }
 0x18d   :  { %v295_v18 = vpop.f32.mrf.mxu0 }
 0x18e   :  { %v828_v42 = vadd.f32 %v764_v57, %v1333_v58  ;;  %v701_v59 = vmul.f32 0.01, %v632_v35  ;;  %v296_v29 = vadd.f32 %v295_v18, %v1199_v33  ;;  %v408_v62 = vpop.f32.mrf.mxu1 }
 0x190   :  { %892 = vst [vmem:[#allocation8 + $0x1b0] sm:$0xff] %v828_v42  ;;  %v765_v22 = vmax.f32 %v632_v35, %v701_v59  ;;  %v409_v49 = vadd.f32 %v408_v62, %v296_v29 }
 0x191   :  { %v521_v0 = vpop.f32.mrf.mxu2 }
 0x192   :  { %v634_v45 = vpop.f32.mrf.mxu3  ;;  %v829_v9 = vadd.f32 %v765_v22, %v1335_v11  ;;  %v702_v26 = vmul.f32 0.01, %v409_v49  ;;  %v522_v54 = vadd.f32 %v521_v0, %v1208_v38 }
 0x194   :  { %893 = vst [vmem:[#allocation8 + $0x1b8] sm:$0xff] %v829_v9  ;;  %v766_v36 = vmax.f32 %v409_v49, %v702_v26  ;;  %v635_v8 = vadd.f32 %v634_v45, %v522_v54 }
 0x195   :  { %v298_v1 = vpop.f32.mrf.mxu0 }
 0x196   :  { %v830_v58 = vadd.f32 %v766_v36, %v1345_v44  ;;  %v703_v23 = vmul.f32 0.01, %v635_v8  ;;  %v299_v30 = vadd.f32 %v298_v1, %v1199_v33  ;;  %v411_v39 = vpop.f32.mrf.mxu1 }
 0x198   :  { %894 = vst [vmem:[#allocation8 + $0x1c0] sm:$0xff] %v830_v58  ;;  %v767_v12 = vmax.f32 %v635_v8, %v703_v23  ;;  %v412_v3 = vadd.f32 %v411_v39, %v299_v30 }
 0x199   :  { %v524_v46 = vpop.f32.mrf.mxu2 }
 0x19a   :  { %v637_v27 = vpop.f32.mrf.mxu3  ;;  %v831_v11 = vadd.f32 %v767_v12, %v1347_v13  ;;  %v704_v41 = vmul.f32 0.01, %v412_v3  ;;  %v525_v32 = vadd.f32 %v524_v46, %v1208_v38 }
 0x19c   :  { %895 = vst [vmem:[#allocation8 + $0x1c8] sm:$0xff] %v831_v11  ;;  %v768_v16 = vmax.f32 %v412_v3, %v704_v41  ;;  %v638_v40 = vadd.f32 %v637_v27, %v525_v32 }
 0x19d   :  { %v301_v43 = vpop.f32.mrf.mxu0 }
 0x19e   :  { %v832_v44 = vadd.f32 %v768_v16, %v1357_v60  ;;  %v705_v20 = vmul.f32 0.01, %v638_v40  ;;  %v302_v61 = vadd.f32 %v301_v43, %v1199_v33  ;;  %v414_v31 = vpop.f32.mrf.mxu1 }
 0x1a0   :  { %896 = vst [vmem:[#allocation8 + $0x1d0] sm:$0xff] %v832_v44  ;;  %v769_v51 = vmax.f32 %v638_v40, %v705_v20  ;;  %v415_v47 = vadd.f32 %v414_v31, %v302_v61 }
 0x1a1   :  { %v527_v24 = vpop.f32.mrf.mxu2 }
 0x1a2   :  { %v640_v5 = vpop.f32.mrf.mxu3  ;;  %v833_v13 = vadd.f32 %v769_v51, %v1359_v15  ;;  %v706_v50 = vmul.f32 0.01, %v415_v47  ;;  %v528_v28 = vadd.f32 %v527_v24, %v1208_v38 }
 0x1a4   :  { %897 = vst [vmem:[#allocation8 + $0x1d8] sm:$0xff] %v833_v13  ;;  %v770_v6 = vmax.f32 %v415_v47, %v706_v50  ;;  %v641_v34 = vadd.f32 %v640_v5, %v528_v28 }
 0x1a5   :  { %v304_v63 = vpop.f32.mrf.mxu0 }
 0x1a6   :  { %v834_v60 = vadd.f32 %v770_v6, %v1369_v2  ;;  %v707_v56 = vmul.f32 0.01, %v641_v34  ;;  %v305_v52 = vadd.f32 %v304_v63, %v1199_v33  ;;  %v417_v21 = vpop.f32.mrf.mxu1 }
 0x1a8   :  { %898 = vst [vmem:[#allocation8 + $0x1e0] sm:$0xff] %v834_v60  ;;  %v771_v53 = vmax.f32 %v641_v34, %v707_v56  ;;  %v418_v10 = vadd.f32 %v417_v21, %v305_v52 }
 0x1a9   :  { %v530_v25 = vpop.f32.mrf.mxu2 }
 0x1aa   :  { %v643_v55 = vpop.f32.mrf.mxu3  ;;  %v835_v15 = vadd.f32 %v771_v53, %v1371_v17  ;;  %v708_v37 = vmul.f32 0.01, %v418_v10  ;;  %v531_v7 = vadd.f32 %v530_v25, %v1208_v38 }
 0x1ac   :  { %899 = vst [vmem:[#allocation8 + $0x1e8] sm:$0xff] %v835_v15  ;;  %v772_v48 = vmax.f32 %v418_v10, %v708_v37  ;;  %v644_v14 = vadd.f32 %v643_v55, %v531_v7 }
 0x1ae   :  { %v836_v57 = vadd.f32 %v772_v48, %v1381_v4  ;;  %v709_v2 = vmul.f32 0.01, %v644_v14 }
 0x1b0   :  { %900 = vst [vmem:[#allocation8 + $0x1f0] sm:$0xff] %v836_v57  ;;  %v773_v33 = vmax.f32 %v644_v14, %v709_v2 }
 0x1b2   :  { %v837_v35 = vadd.f32 %v773_v33, %v1383_v19 }
 0x1b4   :  { %901 = vst [vmem:[#allocation8 + $0x1f8] sm:$0xff] %v837_v35 }
 0x1b5   :  { %914 = dma.vmem_to_hbm [thread:$0]  %s907_s27, 8192, %s909_s30, [#allocation4], %s1031_s20, %s1031_s20, %s1032_s21  }
 0x1b6   :  { %1028 = dma.done.wait [#allocation4], 8192  }
 0x1b7   :  { %1029 = vsyncadd [#allocation4], 4294959104 }
 0x1b8   :  { %919 = vsyncpa [#allocation3], 1 }
 0x1b9   :  { %920 = vsyncpa [#allocation6], 1 }
 0x1ba   :  { %921 = vsyncpa [#allocation4], 1 }

</bundles_post_ra>
